<compile_context>
chip_gen: v7x
topology: tpu7x:2x2x1
jax: 0.10.0
libtpu: 0.0.40
codegen_flags: <defaults>
</compile_context>

<pallas_src>
import functools

import jax
import jax.numpy as jnp
from jax.experimental import pallas as pl
from jax.experimental.pallas import tpu as pltpu


_BN_EPS = 1e-5


def _round_up(n, m):
    return ((n + m - 1) // m) * m


def _resblock_kernel(x_ref, w1_ref, b1_ref, w2_ref, b2_ref, w3_ref, b3_ref,
                     wid_ref, bid_ref, o_ref, *, margin, taps, has_identity_conv):
    """Fused bottleneck residual block for one batch element.

    x_ref : (1, Cin, Pw)    reflect-padded input, flattened spatial, `margin` zero
                            lanes on each side; Pw is a multiple of 128.
    o_ref : (1, Cout, Pout) output on the padded spatial frame (Pout multiple of 128);
                            the wrapper slices out the valid interior pixels.
    All weights/biases already have eval-mode BatchNorm folded in.
    """
    pout = o_ref.shape[-1]
    xw = x_ref[0]                                                   # (Cin, Pw)

    # conv1 (1x1) + BN1 + ReLU — pointwise, so computing it on the reflect-padded
    # domain directly yields the reflect-padded input of conv2.
    y1 = jnp.dot(w1_ref[...], xw, preferred_element_type=jnp.float32) + b1_ref[...]
    y1 = jnp.maximum(y1, 0.0)                                       # (Cmid, Pw)

    # conv2 (3x3, reflect padding) == 9 shifted 1x1 matmuls on the flattened axis.
    acc = None
    for k, off in enumerate(taps):                                  # static unroll (9)
        sl = y1[:, margin + off: margin + off + pout]               # static lane slice
        contrib = jnp.dot(w2_ref[k], sl, preferred_element_type=jnp.float32)
        acc = contrib if acc is None else acc + contrib
    y2 = jnp.maximum(acc + b2_ref[...], 0.0)                        # (Cmid, Pout)

    # conv3 (1x1) + BN3
    y3 = jnp.dot(w3_ref[...], y2, preferred_element_type=jnp.float32) + b3_ref[...]

    # identity branch
    xc = xw[:, margin: margin + pout]                               # (Cin, Pout)
    if has_identity_conv:
        idn = jnp.dot(wid_ref[...], xc,
                      preferred_element_type=jnp.float32) + bid_ref[...]
    else:
        # in_channel == out_channel: plain skip (out += x), no matmul needed.
        idn = xc

    o_ref[0] = jnp.maximum(y3 + idn, 0.0).astype(o_ref.dtype)


def _fold_bn(w, b, gamma, beta, mean, var):
    """Fold eval-mode BatchNorm into the preceding conv's weight/bias."""
    s = gamma * jax.lax.rsqrt(var + _BN_EPS)
    w_f = w * s.reshape((-1,) + (1,) * (w.ndim - 1))
    b_f = s * (b - mean) + beta
    return w_f, b_f


def residual_block(x, params):
    """Residual_Block forward (eval-mode BN) as a fused Pallas kernel.

    x: (N, Cin, H, W) float32 -> (N, Cout, H, W) float32.
    """
    N, Cin, H, W = x.shape
    Cmid = params['w1'].shape[0]
    Cout = params['w3'].shape[0]

    # Fold BatchNorm (running stats) into the convolutions.
    w1f, b1f = _fold_bn(params['w1'], params['b1'],
                        params['g1'], params['be1'], params['m1'], params['v1'])
    w2f, b2f = _fold_bn(params['w2'], params['b2'],
                        params['g2'], params['be2'], params['m2'], params['v2'])
    w3f, b3f = _fold_bn(params['w3'], params['b3'],
                        params['g3'], params['be3'], params['m3'], params['v3'])

    has_identity_conv = params.get('wid') is not None
    if has_identity_conv:
        wid, bid = params['wid'], params['bid']
    else:
        # Dummy (unused) operands so the pallas_call signature stays fixed.
        wid = jnp.zeros((Cout, Cin), dtype=x.dtype)
        bid = jnp.zeros((Cout,), dtype=x.dtype)

    # 3x3 kernel as 9 per-tap (Cmid, Cmid) matrices, tap order k = ky*3 + kx.
    w2taps = jnp.transpose(w2f, (2, 3, 0, 1)).reshape(9, Cmid, Cmid)

    # Reflect-pad spatially, flatten, add a lane margin so every tap is a static slice,
    # and keep both spatial extents 128-aligned (lane-dense loads / unmasked stores).
    H2, W2 = H + 2, W + 2
    P = H2 * W2
    margin = W + 3                              # max |tap offset| on the flat axis
    pout = _round_up(P, 128)                    # lane-dense output frame
    pw = _round_up(pout + 2 * margin, 128)      # lane-dense padded input frame
    xp = jnp.pad(x, ((0, 0), (0, 0), (1, 1), (1, 1)), mode='reflect')
    xw = jnp.pad(xp.reshape(N, Cin, P),
                 ((0, 0), (0, 0), (margin, pw - P - margin)))

    taps = tuple((ky - 1) * W2 + (kx - 1) for ky in range(3) for kx in range(3))

    b1c = b1f.reshape(Cmid, 1)
    b2c = b2f.reshape(Cmid, 1)
    b3c = b3f.reshape(Cout, 1)
    bidc = bid.reshape(Cout, 1)

    # Explicit VMEM budget: double-buffered input/output blocks + weights + live temps.
    bytes_in = Cin * pw * 4
    bytes_out = Cout * pout * 4
    bytes_w = 4 * (w1f.size + b1c.size + w2taps.size + b2c.size +
                   w3f.size + b3c.size + wid.size + bidc.size)
    bytes_tmp = 4 * (2 * Cmid * pw + 4 * Cmid * pout + 4 * Cout * pout)
    vmem_limit = int(2 * bytes_in + 2 * bytes_out + 2 * bytes_w + bytes_tmp + (8 << 20))
    vmem_limit = min(vmem_limit, 64 << 20)      # stay inside v7x per-TC VMEM

    kernel = functools.partial(_resblock_kernel, margin=margin, taps=taps,
                               has_identity_conv=has_identity_conv)

    out = pl.pallas_call(
        kernel,
        out_shape=jax.ShapeDtypeStruct((N, Cout, pout), x.dtype),
        grid_spec=pltpu.PrefetchScalarGridSpec(
            num_scalar_prefetch=0,
            grid=(N,),
            in_specs=[
                pl.BlockSpec((1, Cin, pw), lambda i: (i, 0, 0)),       # x (per image)
                pl.BlockSpec((Cmid, Cin), lambda i: (0, 0)),           # w1 (BN folded)
                pl.BlockSpec((Cmid, 1), lambda i: (0, 0)),             # b1
                pl.BlockSpec((9, Cmid, Cmid), lambda i: (0, 0, 0)),    # w2 taps
                pl.BlockSpec((Cmid, 1), lambda i: (0, 0)),             # b2
                pl.BlockSpec((Cout, Cmid), lambda i: (0, 0)),          # w3
                pl.BlockSpec((Cout, 1), lambda i: (0, 0)),             # b3
                pl.BlockSpec((Cout, Cin), lambda i: (0, 0)),           # identity conv
                pl.BlockSpec((Cout, 1), lambda i: (0, 0)),             # identity bias
            ],
            out_specs=pl.BlockSpec((1, Cout, pout), lambda i: (i, 0, 0)),
        ),
        compiler_params=pltpu.CompilerParams(
            dimension_semantics=("parallel",),
            vmem_limit_bytes=vmem_limit,
        ),
    )(xw, w1f, b1c, w2taps, b2c, w3f, b3c, wid, bidc)

    # Drop alignment tail + reflect border -> (N, Cout, H, W).
    return out[:, :, :P].reshape(N, Cout, H2, W2)[:, :, 1:H + 1, 1:W + 1]


def residual_block_ref(x, params):
    """Pure-JAX reference matching the PyTorch forward (eval-mode BN)."""
    def bn(y, g, b, m, v):
        inv = (g * jax.lax.rsqrt(v + _BN_EPS))[None, :, None, None]
        return (y - m[None, :, None, None]) * inv + b[None, :, None, None]

    y = jnp.einsum('oi,nihw->nohw', params['w1'], x) + params['b1'][None, :, None, None]
    y = jnp.maximum(bn(y, params['g1'], params['be1'], params['m1'], params['v1']), 0.0)
    yp = jnp.pad(y, ((0, 0), (0, 0), (1, 1), (1, 1)), mode='reflect')
    y = jax.lax.conv_general_dilated(
        yp, params['w2'], window_strides=(1, 1), padding='VALID',
        dimension_numbers=('NCHW', 'OIHW', 'NCHW')) + params['b2'][None, :, None, None]
    y = jnp.maximum(bn(y, params['g2'], params['be2'], params['m2'], params['v2']), 0.0)
    y = jnp.einsum('oi,nihw->nohw', params['w3'], y) + params['b3'][None, :, None, None]
    y = bn(y, params['g3'], params['be3'], params['m3'], params['v3'])
    if params.get('wid') is not None:
        sc = jnp.einsum('oi,nihw->nohw', params['wid'], x) + params['bid'][None, :, None, None]
    else:
        sc = x
    return jnp.maximum(y + sc, 0.0)


if __name__ == "__main__":
    # Small shapes consistent with the module: out_channel % 4 == 0, in != out so the
    # identity 1x1 conv path is exercised.
    N, Cin, Cout, H, W = 2, 16, 32, 16, 16
    Cmid = Cout // 4

    key = jax.random.PRNGKey(0)
    ks = jax.random.split(key, 21)
    nrm = lambda k, s: jax.random.normal(k, s, dtype=jnp.float32)

    x = nrm(ks[0], (N, Cin, H, W))
    params = dict(
        w1=0.1 * nrm(ks[1], (Cmid, Cin)),        b1=0.1 * nrm(ks[2], (Cmid,)),
        w2=0.1 * nrm(ks[3], (Cmid, Cmid, 3, 3)), b2=0.1 * nrm(ks[4], (Cmid,)),
        w3=0.1 * nrm(ks[5], (Cout, Cmid)),       b3=0.1 * nrm(ks[6], (Cout,)),
        wid=0.1 * nrm(ks[7], (Cout, Cin)),       bid=0.1 * nrm(ks[8], (Cout,)),
        g1=1.0 + 0.1 * nrm(ks[9], (Cmid,)),  be1=0.1 * nrm(ks[10], (Cmid,)),
        m1=0.1 * nrm(ks[11], (Cmid,)), v1=0.5 + jax.random.uniform(ks[12], (Cmid,)),
        g2=1.0 + 0.1 * nrm(ks[13], (Cmid,)), be2=0.1 * nrm(ks[14], (Cmid,)),
        m2=0.1 * nrm(ks[15], (Cmid,)), v2=0.5 + jax.random.uniform(ks[16], (Cmid,)),
        g3=1.0 + 0.1 * nrm(ks[17], (Cout,)), be3=0.1 * nrm(ks[18], (Cout,)),
        m3=0.1 * nrm(ks[19], (Cout,)), v3=0.5 + jax.random.uniform(ks[20], (Cout,)),
    )

    out = jax.block_until_ready(residual_block(x, params))
    ref = jax.block_until_ready(residual_block_ref(x, params))

    assert out.shape == (N, Cout, H, W)
    assert bool(jnp.all(jnp.isfinite(out)))
    max_err = float(jnp.max(jnp.abs(out - ref)))
    assert jnp.allclose(out, ref, atol=1e-2, rtol=1e-2), max_err
    print("KERNEL_OK")
</pallas_src>

<mosaic_0001>
module attributes {stable_mosaic.version = 11 : i64} {
  func.func @_resblock_kernel(%arg0: i32, %arg1: memref<1x16x512xf32, #tpu.memory_space<vmem>>, %arg2: memref<8x16xf32, #tpu.memory_space<vmem>>, %arg3: memref<8x1xf32, #tpu.memory_space<vmem>>, %arg4: memref<9x8x8xf32, #tpu.memory_space<vmem>>, %arg5: memref<8x1xf32, #tpu.memory_space<vmem>>, %arg6: memref<32x8xf32, #tpu.memory_space<vmem>>, %arg7: memref<32x1xf32, #tpu.memory_space<vmem>>, %arg8: memref<32x16xf32, #tpu.memory_space<vmem>>, %arg9: memref<32x1xf32, #tpu.memory_space<vmem>>, %arg10: memref<1x32x384xf32, #tpu.memory_space<vmem>>) attributes {dimension_semantics = [#tpu.dimension_semantics<parallel>], iteration_bounds = array<i64: 2>, scalar_prefetch = 0 : i64, scratch_operands = 0 : i64, tpu.core_type = #tpu.core_type<tc>, window_params = [{transform_indices = @transform_0, window_bounds = array<i64: 1, 16, 512>}, {pipeline_mode = #tpu.pipeline_mode<synchronous>, transform_indices = @transform_1, window_bounds = array<i64: 8, 16>}, {pipeline_mode = #tpu.pipeline_mode<synchronous>, transform_indices = @transform_2, window_bounds = array<i64: 8, 1>}, {pipeline_mode = #tpu.pipeline_mode<synchronous>, transform_indices = @transform_3, window_bounds = array<i64: 9, 8, 8>}, {pipeline_mode = #tpu.pipeline_mode<synchronous>, transform_indices = @transform_4, window_bounds = array<i64: 8, 1>}, {pipeline_mode = #tpu.pipeline_mode<synchronous>, transform_indices = @transform_5, window_bounds = array<i64: 32, 8>}, {pipeline_mode = #tpu.pipeline_mode<synchronous>, transform_indices = @transform_6, window_bounds = array<i64: 32, 1>}, {pipeline_mode = #tpu.pipeline_mode<synchronous>, transform_indices = @transform_7, window_bounds = array<i64: 32, 16>}, {pipeline_mode = #tpu.pipeline_mode<synchronous>, transform_indices = @transform_8, window_bounds = array<i64: 32, 1>}, {transform_indices = @transform_9, window_bounds = array<i64: 1, 32, 384>}]} {
    %c0 = arith.constant 0 : index
    %c0_0 = arith.constant 0 : index
    %c0_1 = arith.constant 0 : index
    %0 = vector.load %arg1[%c0, %c0_0, %c0_1] : memref<1x16x512xf32, #tpu.memory_space<vmem>>, vector<1x16x512xf32>
    %1 = vector.shape_cast %0 : vector<1x16x512xf32> to vector<16x512xf32>
    %c0_2 = arith.constant 0 : index
    %c0_3 = arith.constant 0 : index
    %2 = vector.load %arg2[%c0_2, %c0_3] : memref<8x16xf32, #tpu.memory_space<vmem>>, vector<8x16xf32>
    %cst = arith.constant dense<0.000000e+00> : vector<8x512xf32>
    %3 = tpu.matmul %2, %1, %cst {dimension_numbers = #tpu.dot_dimension_numbers<[1], [0], [0], [1], [0, 0, 1, 1], [], []>} : vector<8x16xf32>, vector<16x512xf32>, vector<8x512xf32> -> vector<8x512xf32>
    %c0_4 = arith.constant 0 : index
    %c0_5 = arith.constant 0 : index
    %4 = vector.load %arg3[%c0_4, %c0_5] : memref<8x1xf32, #tpu.memory_space<vmem>>, vector<8x1xf32>
    %5 = vector.broadcast %4 : vector<8x1xf32> to vector<8x512xf32>
    %6 = arith.addf %3, %5 : vector<8x512xf32>
    %cst_6 = arith.constant 0.000000e+00 : f32
    %7 = vector.broadcast %cst_6 : f32 to vector<8x512xf32>
    %8 = arith.maximumf %6, %7 : vector<8x512xf32>
    %9 = vector.extract_strided_slice %8 {offsets = [0, 0], sizes = [8, 384], strides = [1, 1]} : vector<8x512xf32> to vector<8x384xf32>
    %c0_7 = arith.constant 0 : index
    %c0_8 = arith.constant 0 : index
    %c0_9 = arith.constant 0 : index
    %10 = vector.load %arg4[%c0_7, %c0_8, %c0_9] : memref<9x8x8xf32, #tpu.memory_space<vmem>>, vector<1x8x8xf32>
    %11 = vector.shape_cast %10 : vector<1x8x8xf32> to vector<8x8xf32>
    %cst_10 = arith.constant dense<0.000000e+00> : vector<8x384xf32>
    %12 = tpu.matmul %11, %9, %cst_10 {dimension_numbers = #tpu.dot_dimension_numbers<[1], [0], [0], [1], [0, 0, 1, 1], [], []>} : vector<8x8xf32>, vector<8x384xf32>, vector<8x384xf32> -> vector<8x384xf32>
    %13 = vector.extract_strided_slice %8 {offsets = [0, 1], sizes = [8, 384], strides = [1, 1]} : vector<8x512xf32> to vector<8x384xf32>
    %c1 = arith.constant 1 : index
    %c0_11 = arith.constant 0 : index
    %c0_12 = arith.constant 0 : index
    %14 = vector.load %arg4[%c1, %c0_11, %c0_12] : memref<9x8x8xf32, #tpu.memory_space<vmem>>, vector<1x8x8xf32>
    %15 = vector.shape_cast %14 : vector<1x8x8xf32> to vector<8x8xf32>
    %cst_13 = arith.constant dense<0.000000e+00> : vector<8x384xf32>
    %16 = tpu.matmul %15, %13, %cst_13 {dimension_numbers = #tpu.dot_dimension_numbers<[1], [0], [0], [1], [0, 0, 1, 1], [], []>} : vector<8x8xf32>, vector<8x384xf32>, vector<8x384xf32> -> vector<8x384xf32>
    %17 = arith.addf %12, %16 : vector<8x384xf32>
    %18 = vector.extract_strided_slice %8 {offsets = [0, 2], sizes = [8, 384], strides = [1, 1]} : vector<8x512xf32> to vector<8x384xf32>
    %c2 = arith.constant 2 : index
    %c0_14 = arith.constant 0 : index
    %c0_15 = arith.constant 0 : index
    %19 = vector.load %arg4[%c2, %c0_14, %c0_15] : memref<9x8x8xf32, #tpu.memory_space<vmem>>, vector<1x8x8xf32>
    %20 = vector.shape_cast %19 : vector<1x8x8xf32> to vector<8x8xf32>
    %cst_16 = arith.constant dense<0.000000e+00> : vector<8x384xf32>
    %21 = tpu.matmul %20, %18, %cst_16 {dimension_numbers = #tpu.dot_dimension_numbers<[1], [0], [0], [1], [0, 0, 1, 1], [], []>} : vector<8x8xf32>, vector<8x384xf32>, vector<8x384xf32> -> vector<8x384xf32>
    %22 = arith.addf %17, %21 : vector<8x384xf32>
    %23 = vector.extract_strided_slice %8 {offsets = [0, 18], sizes = [8, 384], strides = [1, 1]} : vector<8x512xf32> to vector<8x384xf32>
    %c3 = arith.constant 3 : index
    %c0_17 = arith.constant 0 : index
    %c0_18 = arith.constant 0 : index
    %24 = vector.load %arg4[%c3, %c0_17, %c0_18] : memref<9x8x8xf32, #tpu.memory_space<vmem>>, vector<1x8x8xf32>
    %25 = vector.shape_cast %24 : vector<1x8x8xf32> to vector<8x8xf32>
    %cst_19 = arith.constant dense<0.000000e+00> : vector<8x384xf32>
    %26 = tpu.matmul %25, %23, %cst_19 {dimension_numbers = #tpu.dot_dimension_numbers<[1], [0], [0], [1], [0, 0, 1, 1], [], []>} : vector<8x8xf32>, vector<8x384xf32>, vector<8x384xf32> -> vector<8x384xf32>
    %27 = arith.addf %22, %26 : vector<8x384xf32>
    %28 = vector.extract_strided_slice %8 {offsets = [0, 19], sizes = [8, 384], strides = [1, 1]} : vector<8x512xf32> to vector<8x384xf32>
    %c4 = arith.constant 4 : index
    %c0_20 = arith.constant 0 : index
    %c0_21 = arith.constant 0 : index
    %29 = vector.load %arg4[%c4, %c0_20, %c0_21] : memref<9x8x8xf32, #tpu.memory_space<vmem>>, vector<1x8x8xf32>
    %30 = vector.shape_cast %29 : vector<1x8x8xf32> to vector<8x8xf32>
    %cst_22 = arith.constant dense<0.000000e+00> : vector<8x384xf32>
    %31 = tpu.matmul %30, %28, %cst_22 {dimension_numbers = #tpu.dot_dimension_numbers<[1], [0], [0], [1], [0, 0, 1, 1], [], []>} : vector<8x8xf32>, vector<8x384xf32>, vector<8x384xf32> -> vector<8x384xf32>
    %32 = arith.addf %27, %31 : vector<8x384xf32>
    %33 = vector.extract_strided_slice %8 {offsets = [0, 20], sizes = [8, 384], strides = [1, 1]} : vector<8x512xf32> to vector<8x384xf32>
    %c5 = arith.constant 5 : index
    %c0_23 = arith.constant 0 : index
    %c0_24 = arith.constant 0 : index
    %34 = vector.load %arg4[%c5, %c0_23, %c0_24] : memref<9x8x8xf32, #tpu.memory_space<vmem>>, vector<1x8x8xf32>
    %35 = vector.shape_cast %34 : vector<1x8x8xf32> to vector<8x8xf32>
    %cst_25 = arith.constant dense<0.000000e+00> : vector<8x384xf32>
    %36 = tpu.matmul %35, %33, %cst_25 {dimension_numbers = #tpu.dot_dimension_numbers<[1], [0], [0], [1], [0, 0, 1, 1], [], []>} : vector<8x8xf32>, vector<8x384xf32>, vector<8x384xf32> -> vector<8x384xf32>
    %37 = arith.addf %32, %36 : vector<8x384xf32>
    %38 = vector.extract_strided_slice %8 {offsets = [0, 36], sizes = [8, 384], strides = [1, 1]} : vector<8x512xf32> to vector<8x384xf32>
    %c6 = arith.constant 6 : index
    %c0_26 = arith.constant 0 : index
    %c0_27 = arith.constant 0 : index
    %39 = vector.load %arg4[%c6, %c0_26, %c0_27] : memref<9x8x8xf32, #tpu.memory_space<vmem>>, vector<1x8x8xf32>
    %40 = vector.shape_cast %39 : vector<1x8x8xf32> to vector<8x8xf32>
    %cst_28 = arith.constant dense<0.000000e+00> : vector<8x384xf32>
    %41 = tpu.matmul %40, %38, %cst_28 {dimension_numbers = #tpu.dot_dimension_numbers<[1], [0], [0], [1], [0, 0, 1, 1], [], []>} : vector<8x8xf32>, vector<8x384xf32>, vector<8x384xf32> -> vector<8x384xf32>
    %42 = arith.addf %37, %41 : vector<8x384xf32>
    %43 = vector.extract_strided_slice %8 {offsets = [0, 37], sizes = [8, 384], strides = [1, 1]} : vector<8x512xf32> to vector<8x384xf32>
    %c7 = arith.constant 7 : index
    %c0_29 = arith.constant 0 : index
    %c0_30 = arith.constant 0 : index
    %44 = vector.load %arg4[%c7, %c0_29, %c0_30] : memref<9x8x8xf32, #tpu.memory_space<vmem>>, vector<1x8x8xf32>
    %45 = vector.shape_cast %44 : vector<1x8x8xf32> to vector<8x8xf32>
    %cst_31 = arith.constant dense<0.000000e+00> : vector<8x384xf32>
    %46 = tpu.matmul %45, %43, %cst_31 {dimension_numbers = #tpu.dot_dimension_numbers<[1], [0], [0], [1], [0, 0, 1, 1], [], []>} : vector<8x8xf32>, vector<8x384xf32>, vector<8x384xf32> -> vector<8x384xf32>
    %47 = arith.addf %42, %46 : vector<8x384xf32>
    %48 = vector.extract_strided_slice %8 {offsets = [0, 38], sizes = [8, 384], strides = [1, 1]} : vector<8x512xf32> to vector<8x384xf32>
    %c8 = arith.constant 8 : index
    %c0_32 = arith.constant 0 : index
    %c0_33 = arith.constant 0 : index
    %49 = vector.load %arg4[%c8, %c0_32, %c0_33] : memref<9x8x8xf32, #tpu.memory_space<vmem>>, vector<1x8x8xf32>
    %50 = vector.shape_cast %49 : vector<1x8x8xf32> to vector<8x8xf32>
    %cst_34 = arith.constant dense<0.000000e+00> : vector<8x384xf32>
    %51 = tpu.matmul %50, %48, %cst_34 {dimension_numbers = #tpu.dot_dimension_numbers<[1], [0], [0], [1], [0, 0, 1, 1], [], []>} : vector<8x8xf32>, vector<8x384xf32>, vector<8x384xf32> -> vector<8x384xf32>
    %52 = arith.addf %47, %51 : vector<8x384xf32>
    %c0_35 = arith.constant 0 : index
    %c0_36 = arith.constant 0 : index
    %53 = vector.load %arg5[%c0_35, %c0_36] : memref<8x1xf32, #tpu.memory_space<vmem>>, vector<8x1xf32>
    %54 = vector.broadcast %53 : vector<8x1xf32> to vector<8x384xf32>
    %55 = arith.addf %52, %54 : vector<8x384xf32>
    %cst_37 = arith.constant 0.000000e+00 : f32
    %56 = vector.broadcast %cst_37 : f32 to vector<8x384xf32>
    %57 = arith.maximumf %55, %56 : vector<8x384xf32>
    %c0_38 = arith.constant 0 : index
    %c0_39 = arith.constant 0 : index
    %58 = vector.load %arg6[%c0_38, %c0_39] : memref<32x8xf32, #tpu.memory_space<vmem>>, vector<32x8xf32>
    %cst_40 = arith.constant dense<0.000000e+00> : vector<32x384xf32>
    %59 = tpu.matmul %58, %57, %cst_40 {dimension_numbers = #tpu.dot_dimension_numbers<[1], [0], [0], [1], [0, 0, 1, 1], [], []>} : vector<32x8xf32>, vector<8x384xf32>, vector<32x384xf32> -> vector<32x384xf32>
    %c0_41 = arith.constant 0 : index
    %c0_42 = arith.constant 0 : index
    %60 = vector.load %arg7[%c0_41, %c0_42] : memref<32x1xf32, #tpu.memory_space<vmem>>, vector<32x1xf32>
    %61 = vector.broadcast %60 : vector<32x1xf32> to vector<32x384xf32>
    %62 = arith.addf %59, %61 : vector<32x384xf32>
    %63 = vector.extract_strided_slice %1 {offsets = [0, 19], sizes = [16, 384], strides = [1, 1]} : vector<16x512xf32> to vector<16x384xf32>
    %c0_43 = arith.constant 0 : index
    %c0_44 = arith.constant 0 : index
    %64 = vector.load %arg8[%c0_43, %c0_44] : memref<32x16xf32, #tpu.memory_space<vmem>>, vector<32x16xf32>
    %cst_45 = arith.constant dense<0.000000e+00> : vector<32x384xf32>
    %65 = tpu.matmul %64, %63, %cst_45 {dimension_numbers = #tpu.dot_dimension_numbers<[1], [0], [0], [1], [0, 0, 1, 1], [], []>} : vector<32x16xf32>, vector<16x384xf32>, vector<32x384xf32> -> vector<32x384xf32>
    %c0_46 = arith.constant 0 : index
    %c0_47 = arith.constant 0 : index
    %66 = vector.load %arg9[%c0_46, %c0_47] : memref<32x1xf32, #tpu.memory_space<vmem>>, vector<32x1xf32>
    %67 = vector.broadcast %66 : vector<32x1xf32> to vector<32x384xf32>
    %68 = arith.addf %65, %67 : vector<32x384xf32>
    %69 = arith.addf %62, %68 : vector<32x384xf32>
    %cst_48 = arith.constant 0.000000e+00 : f32
    %70 = vector.broadcast %cst_48 : f32 to vector<32x384xf32>
    %71 = arith.maximumf %69, %70 : vector<32x384xf32>
    %c0_49 = arith.constant 0 : index
    %c0_50 = arith.constant 0 : index
    %c0_51 = arith.constant 0 : index
    %72 = vector.load %arg10[%c0_49, %c0_50, %c0_51] : memref<1x32x384xf32, #tpu.memory_space<vmem>>, vector<1x32x384xf32>
    %73 = vector.shape_cast %72 : vector<1x32x384xf32> to vector<32x384xf32>
    %74 = vector.shape_cast %71 : vector<32x384xf32> to vector<1x32x384xf32>
    tpu.vector_store %arg10[%c0_49, %c0_50, %c0_51], %74 {strides = array<i32>} : memref<1x32x384xf32, #tpu.memory_space<vmem>>, vector<1x32x384xf32>,
    return
  }
  func.func @transform_0(%arg0: i32) -> (i32, i32, i32) {
    %c0_i32 = arith.constant 0 : i32
    %c0_i32_0 = arith.constant 0 : i32
    %c0_i32_1 = arith.constant 0 : i32
    return %arg0, %c0_i32, %c0_i32_0 : i32, i32, i32
  }
  func.func @transform_1(%arg0: i32) -> (i32, i32) {
    %c0_i32 = arith.constant 0 : i32
    %c0_i32_0 = arith.constant 0 : i32
    %c0_i32_1 = arith.constant 0 : i32
    return %c0_i32, %c0_i32_0 : i32, i32
  }
  func.func @transform_2(%arg0: i32) -> (i32, i32) {
    %c0_i32 = arith.constant 0 : i32
    %c0_i32_0 = arith.constant 0 : i32
    %c0_i32_1 = arith.constant 0 : i32
    return %c0_i32, %c0_i32_0 : i32, i32
  }
  func.func @transform_3(%arg0: i32) -> (i32, i32, i32) {
    %c0_i32 = arith.constant 0 : i32
    %c0_i32_0 = arith.constant 0 : i32
    %c0_i32_1 = arith.constant 0 : i32
    %c0_i32_2 = arith.constant 0 : i32
    return %c0_i32, %c0_i32_0, %c0_i32_1 : i32, i32, i32
  }
  func.func @transform_4(%arg0: i32) -> (i32, i32) {
    %c0_i32 = arith.constant 0 : i32
    %c0_i32_0 = arith.constant 0 : i32
    %c0_i32_1 = arith.constant 0 : i32
    return %c0_i32, %c0_i32_0 : i32, i32
  }
  func.func @transform_5(%arg0: i32) -> (i32, i32) {
    %c0_i32 = arith.constant 0 : i32
    %c0_i32_0 = arith.constant 0 : i32
    %c0_i32_1 = arith.constant 0 : i32
    return %c0_i32, %c0_i32_0 : i32, i32
  }
  func.func @transform_6(%arg0: i32) -> (i32, i32) {
    %c0_i32 = arith.constant 0 : i32
    %c0_i32_0 = arith.constant 0 : i32
    %c0_i32_1 = arith.constant 0 : i32
    return %c0_i32, %c0_i32_0 : i32, i32
  }
  func.func @transform_7(%arg0: i32) -> (i32, i32) {
    %c0_i32 = arith.constant 0 : i32
    %c0_i32_0 = arith.constant 0 : i32
    %c0_i32_1 = arith.constant 0 : i32
    return %c0_i32, %c0_i32_0 : i32, i32
  }
  func.func @transform_8(%arg0: i32) -> (i32, i32) {
    %c0_i32 = arith.constant 0 : i32
    %c0_i32_0 = arith.constant 0 : i32
    %c0_i32_1 = arith.constant 0 : i32
    return %c0_i32, %c0_i32_0 : i32, i32
  }
  func.func @transform_9(%arg0: i32) -> (i32, i32, i32) {
    %c0_i32 = arith.constant 0 : i32
    %c0_i32_0 = arith.constant 0 : i32
    %c0_i32_1 = arith.constant 0 : i32
    return %arg0, %c0_i32, %c0_i32_0 : i32, i32, i32
  }
}

</mosaic_0001>

<bundles_post_ra>
// kernel: tpu_custom_call.1
= control target key start
LH: loop header
LB: loop body
LE: loop exit
PB: predicated region body
PF: predicated region fallthrough
CT: control target
= control target key end

     0   :  { %14 = vsyncpa [#allocation3], 0  ;;  %s3370_s0 = inlined_call_operand.vmem [shape: f32[2,16,512], index: 0, kind: input, shape index: {}]   ;;  %s3371_s1 = inlined_call_operand.vmem [shape: f32[8,16], index: 1, kind: input, shape index: {}]   ;;  %s3372_s2 = inlined_call_operand.vmem [shape: f32[8,1], index: 2, kind: input, shape index: {}]   ;;  %s3373_s3 = inlined_call_operand.vmem [shape: f32[9,8,8], index: 3, kind: input, shape index: {}]   ;;  %s3374_s4 = inlined_call_operand.vmem [shape: f32[8,1], index: 4, kind: input, shape index: {}]   ;;  %s3375_s5 = inlined_call_operand.vmem [shape: f32[32,8], index: 5, kind: input, shape index: {}]   ;;  %s3376_s6 = inlined_call_operand.vmem [shape: f32[32,1], index: 6, kind: input, shape index: {}]   ;;  %s3377_s7 = inlined_call_operand.vmem [shape: f32[32,16], index: 7, kind: input, shape index: {}]   ;;  %s3378_s8 = inlined_call_operand.vmem [shape: f32[32,1], index: 8, kind: input, shape index: {}]   ;;  %s3379_s9 = inlined_call_operand.hbm [shape: f32[2,32,384], index: 9, kind: output, shape index: {}]  }
   0x1   :  { %16 = vsyncpa [#allocation3 + $0x1], 0  ;;  %s2963_s30 = smov 0   ;;  %s2965_s10 = smov 0  }
   0x2   :  { %s2967_s11 = smov 0   ;;  %s2969_s12 = smov 0  }
   0x3 LB: > { %s2984_s13 = sadd.s32 4294967295, %s2897_s12   ;;  %s2543_s14 = sadd.s32 4294967294, %s2897_s12   ;;  %s2897_s12 = sphi %s2969_s12, %s3385_s12   ;;  %s2893_s11 = sphi %s2967_s11, %s3384_s11   ;;  %s2889_s10 = sphi %s2965_s10, %s3383_s10   ;;  %s2885_s30 = sphi %s2963_s30, %s3382_s30  }
   0x4   : > { %s2988_s15 = sadd.s32 1, %s2897_s12   ;;  %s223_s16 = sadd.s32 1, %s2893_s11 }
   0x5   : > { %s220_s17 = ssub.s32 %s2897_s12, %s2988_s15  ;;  %p233_p0 = scmp.ne.s32.totalorder %s2893_s11, %s2889_s10 }
   0x6   : > { %p221_p1 = scmp.eq.s32.totalorder %s220_s17, 0  ;;  %p234_p2 = scmp.eq.s32.totalorder %s2984_s13, 1 }
   0x7   : > { %p239_p3 = scmp.ne.s32.totalorder %s2889_s10, %s2885_s30  ;;  %p240_p4 = scmp.eq.s32.totalorder %s2543_s14, 1 }
   0x8   : > { %s2999_s18 = scalar_select %p221_p1, %s2893_s11, %s223_s16  }
   0x9   : > { %p3001_p5 = por %p234_p2, %p233_p0  ;;  %p3005_p6 = por %p240_p4, %p239_p3 }
   0xa   : > { %p2546_p7 = scmp.ge.s32.totalorder %s2897_s12, 1  ;;  %p290_p8 = scmp.lt.s32.totalorder %s2897_s12, 3 }
   0xc   : > { %p291_p9 = pnand %p2546_p7, %p290_p8 }
   0xd   : > { %p326_p10 = scmp.lt.s32.totalorder (!%p291_p9), %s2984_s13, 1  ;;  %v340_v0 = vld [vmem:[%s3372_s2] sm:$0xff] (!%p291_p9)  ;;  %v2899_v1 = vmov (!%p291_p9), 0.0   ;;  %v2900_v2 = vmov (!%p291_p9), 0   ;;  %vm346_vm0 = vcmask (!%p291_p9), 130048   ;;  %s2901_s14 = smov (!%p291_p9), 127  }
   0xe   : > { %294 = sbr.rel (%p291_p9) target bundleno = 907 (0x38b), region = 56  ;;  %414 = vmatprep.mubr.f32.mxu0 (!%p291_p9), %v2899_v1  ;;  %485 = vmatprep.mubr.f32.mxu1 (!%p291_p9), %v2899_v1  ;;  %v339_v19 = vld [vmem:[%s3371_s1] sm:$0xff] (!%p291_p9)  ;;  %s2902_s16 = smov (!%p291_p9), 126   ;;  %vm2905_vm1 = vmmov (!%p291_p9), 0   ;;  %v1973_v33 = vld [vmem:[%s3376_s6 + $0x10] sm:$0xff] (!%p291_p9)  ;;  %v1974_v38 = vld [vmem:[%s3376_s6 + $0x18] sm:$0xff] (!%p291_p9) }
   0xf   : > { %2813 = vset.pattern.permute.xlu0 (!%p291_p9), %v2900_v2  ;;  %2814 = vset.pattern.permute.xlu1 (!%p291_p9), %v2900_v2  ;;  %s2903_s17 = smov (!%p291_p9), 110   ;;  %s2904_s21 = smov (!%p291_p9), 109   ;;  %v1971_v34 = vld [vmem:[%s3376_s6] sm:$0xff] (!%p291_p9)  ;;  %v2187_v36 = vld [vmem:[%s3378_s8 + $0x10] sm:$0xff] (!%p291_p9)  ;;  %v1972_v39 = vld [vmem:[%s3376_s6 + $0x8] sm:$0xff] (!%p291_p9)  ;;  %vm511_vm2 = vcmask (!%p291_p9), 1039360  }
  0x10   : > { %343 = vperm.xlu0 (!%p291_p9), %2813, %v340_v0   ;;  %s2906_s22 = smov (!%p291_p9), 108   ;;  %s2909_s25 = smov (!%p291_p9), 90   ;;  %v2185_v35 = vld [vmem:[%s3378_s8] sm:$0xff] (!%p291_p9)  ;;  %v2186_v40 = vld [vmem:[%s3378_s8 + $0x8] sm:$0xff] (!%p291_p9)  ;;  %v2188_v41 = vld [vmem:[%s3378_s8 + $0x18] sm:$0xff] (!%p291_p9)  ;;  %vm518_vm3 = vcmask (!%p291_p9), 64512  }
  0x11   : > { %v1955_v37 = vld [vmem:[%s3374_s4] sm:$0xff] (!%p291_p9)  ;;  %v2551_v46 = vld [vmem:[%s3373_s3 + $0x8] sm:$0xff] (!%p291_p9)  ;;  %vm817_vm4 = vcmask (!%p291_p9), 1031168   ;;  %vm981_vm5 = vcmask (!%p291_p9), 900096   ;;  %vm1145_vm6 = vcmask (!%p291_p9), 891904   ;;  %v2556_v60 = vld [vmem:[%s3373_s3 + $0x10] sm:$0xff] (!%p291_p9) }
  0x12   : > { %v496_v53 = vld [vmem:[%s3373_s3] sm:$0xff] (!%p291_p9)  ;;  %vm1309_vm7 = vcmask (!%p291_p9), 883712   ;;  %vm1473_vm8 = vcmask (!%p291_p9), 752640   ;;  %vm1637_vm9 = vcmask (!%p291_p9), 744448   ;;  %vm1801_vm10 = vcmask (!%p291_p9), 736256   ;;  %s2910_s28 = smov (!%p291_p9), [#allocation2]  }
  0x13   : > { %s2839_s29 = sshll.u32 (!%p291_p9), %s2910_s28, 4  ;;  %s2840_s29 = int_to_ptr.vmem [resolvable:$false] %s2839_s29 }
  0x15   : > { %s327_s23 = scalar_select %p326_p10, %s2984_s13, 1 }
  0x17   : > { %s2596_s24 = sshll.u32 %s327_s23, 6  ;;  %s2907_s23 = smov 92  }
  0x18   : > { %s330_s27 = scalar_lea.vmem %s3370_s0, %s2596_s24  ;;  %s2908_s24 = smov 91  }
  0x19   : > { %v3021_v3 = vld [vmem:[%s330_s27 + $0x28] sm:$0xff]  ;;  %v3023_v4 = vld [vmem:[%s330_s27 + $0x30] sm:$0xff]  ;;  %v3033_v9 = vld [vmem:[%s330_s27 + $0x18] sm:$0xff] }
  0x1a   : > { %v3025_v5 = vld [vmem:[%s330_s27 + $0x8] sm:$0xff]  ;;  %v2820_v6 = vpack.i.bf16 %v3023_v4, %v3021_v3  ;;  %v3029_v7 = vld [vmem:[%s330_s27 + $0x10] sm:$0xff]  ;;  %v3035_v10 = vld [vmem:[%s330_s27 + $0x38] sm:$0xff] }
  0x1b   : > { %v2689_v8 = vpack.c.bf16 %v3021_v3, %v3025_v5  ;;  %v2815_v11 = vpack.i.bf16 %v3029_v7, %v3025_v5  ;;  %v2830_v12 = vpack.i.bf16 %v3035_v10, %v3033_v9  ;;  %v2693_v13 = vpack.c.bf16 %v3035_v10, %v3033_v9  ;;  %v3043_v14 = vld [vmem:[%s330_s27] sm:$0xff] }
  0x1c   : > { %v3045_v15 = vld [vmem:[%s330_s27 + $0x20] sm:$0xff]  ;;  %v2695_v16 = vpack.c.bf16 %v3023_v4, %v3029_v7  ;;  %v2559_v4 = vld [vmem:[%s3373_s3 + $0x18] sm:$0xff] }
  0x1d   : > { %2690 = vmatprep.subr.bf16.mxu0 %v2689_v8  ;;  %v2825_v17 = vpack.i.bf16 %v3045_v15, %v3043_v14  ;;  %v2691_v18 = vpack.c.bf16 %v3045_v15, %v3043_v14  ;;  %2694 = vmatprep.subr.bf16.mxu1 %v2693_v13 }
  0x1e   : > { %2696 = vmatpush1.bf16.msra.mxu1 %v2695_v16 }
  0x1f   : > { %2692 = vmatpush1.bf16.msra.mxu0 %v2691_v18  ;;  %2626 = vmatprep.subr.mxu1 %v2899_v1 }
  0x21   : > { %2550 = vmatmul.mubr.msk.f32.vlgmr.msra.gmra.mrb[0].mxu1 %vm346_vm0, %v339_v19 }
  0x22   : > { %2549 = vmatmul.mubr.msk.f32.vlgmr.msra.gmra.mrb[0].mxu0 %vm346_vm0, %v339_v19  ;;  %2628 = vmatprep.mubr.msk.f32.mxu1 %vm2905_vm1, %v2899_v1 }
  0x23   : > { %586 = vmatprep.mubr.f32.mxu0 %v2899_v1 }
  0x8f   : > { %v344_v20 = vpop.permute.xlu0 %343 }
  0xf4   : > { %v487_v22 = vpop.f32.mrb[0].mxu1 }
  0xf5   : > { %v416_v21 = vpop.f32.mrb[0].mxu0  ;;  %v488_v23 = vadd.f32 %v487_v22, %v344_v20  ;;  %v489_v25 = vpop.f32.mrb[1].mxu1  ;;  %v2565_v22 = vld [vmem:[%s3373_s3 + $0x28] sm:$0xff] }
  0xf6   : > { %v418_v24 = vpop.f32.mrb[1].mxu0  ;;  %v417_v27 = vadd.f32 %v416_v21, %v344_v20  ;;  %v490_v31 = vadd.f32 %v489_v25, %v344_v20 }
  0xf7   : > { %v419_v26 = vadd.f32 %v418_v24, %v344_v20  ;;  %v3060_v28 = vmax.f32 %v488_v23, 0.0 }
  0xf8   : > { %v3066_v30 = vmax.f32 %v417_v27, 0.0  ;;  %v495_v32 = vmax.f32 %v490_v31, 0.0  ;;  %v2568_v31 = vld [vmem:[%s3373_s3 + $0x30] sm:$0xff] }
  0xf9   : > { %v3062_v29 = vmax.f32 %v419_v26, 0.0  ;;  %507 = vrot.lane.b32.xlu1 %v3060_v28, %s2901_s14 }
  0xfb   : > { %505 = vrot.lane.b32.xlu0 %v3062_v29, %s2901_s14 }
  0xfd   : > { %503 = vrot.lane.b32.xlu1 %v3066_v30, %s2901_s14 }
  0xff   : > { %811 = vrot.lane.b32.xlu0 %v3062_v29, %s2902_s16 }
 0x101   : > { %813 = vrot.lane.b32.xlu1 %v3060_v28, %s2902_s16 }
 0x103   : > { %809 = vrot.lane.b32.xlu0 %v3066_v30, %s2902_s16 }
 0x105   : > { %973 = vrot.lane.b32.xlu1 %v3066_v30, %s2903_s17 }
 0x107   : > { %977 = vrot.lane.b32.xlu0 %v3060_v28, %s2903_s17 }
 0x109   : > { %975 = vrot.lane.b32.xlu1 %v3062_v29, %s2903_s17 }
 0x10b   : > { %1137 = vrot.lane.b32.xlu0 %v3066_v30, %s2904_s21 }
 0x10d   : > { %1141 = vrot.lane.b32.xlu1 %v3060_v28, %s2904_s21 }
 0x10f   : > { %1139 = vrot.lane.b32.xlu0 %v3062_v29, %s2904_s21 }
 0x111   : > { %1305 = vrot.lane.b32.xlu1 %v3060_v28, %s2906_s22 }
 0x113   : > { %1301 = vrot.lane.b32.xlu0 %v3066_v30, %s2906_s22 }
 0x115   : > { %1469 = vrot.lane.b32.xlu1 %v3060_v28, %s2907_s23 }
 0x117   : > { %1303 = vrot.lane.b32.xlu0 %v3062_v29, %s2906_s22 }
 0x119   : > { %509 = vrot.lane.b32.xlu1 %v495_v32, %s2901_s14  ;;  %s2841_s14 = scalar_lea.vmem %s2840_s29, 3072 }
 0x11b   : > { %1465 = vrot.lane.b32.xlu0 %v3066_v30, %s2907_s23 }
 0x11d   : > { %815 = vrot.lane.b32.xlu1 %v495_v32, %s2902_s16  ;;  %s323_s16 = sand.u32 1, %s2889_s10  }
 0x11e   : > { %s3329_s26 = scalar_lea.sflag [#allocation3], %s323_s16 }
 0x11f   : > { %1467 = vrot.lane.b32.xlu0 %v3062_v29, %s2907_s23 }
 0x121   : > { %1629 = vrot.lane.b32.xlu1 %v3066_v30, %s2908_s24 }
 0x123   : > { %1633 = vrot.lane.b32.xlu0 %v3060_v28, %s2908_s24 }
 0x125   : > { %979 = vrot.lane.b32.xlu1 %v495_v32, %s2903_s17  ;;  %s2759_s17 = smul.u32 96, %s323_s16 }
 0x127   : > { %1143 = vrot.lane.b32.xlu0 %v495_v32, %s2904_s21 }
 0x129   : > { %1631 = vrot.lane.b32.xlu1 %v3062_v29, %s2908_s24 }
 0x12b   : > { %1307 = vrot.lane.b32.xlu0 %v495_v32, %s2906_s22  ;;  %s2760_s22 = smul.u32 1536, %s2984_s13 }
 0x12d   : > { %1797 = vrot.lane.b32.xlu1 %v3060_v28, %s2909_s25 }
 0x12f   : > { %1795 = vrot.lane.b32.xlu0 %v3062_v29, %s2909_s25 }
 0x131   : > { %1471 = vrot.lane.b32.xlu1 %v495_v32, %s2907_s23 }
 0x133   : > { %1793 = vrot.lane.b32.xlu0 %v3066_v30, %s2909_s25 }
 0x135   : > { %1635 = vrot.lane.b32.xlu1 %v495_v32, %s2908_s24 }
 0x137   : > { %1799 = vrot.lane.b32.xlu0 %v495_v32, %s2909_s25  ;;  %s3319_s25 = scalar_lea.hbm %s3379_s9, %s2760_s22 }
 0x139   : > { %1958 = vperm.xlu1 %2814, %v1955_v37  }
 0x13b   : > { %2816 = vrot.lane.b32.xlu0 %v2815_v11, %s2904_s21 }
 0x13d   : > { %2821 = vrot.lane.b32.xlu1 %v2820_v6, %s2904_s21 }
 0x13f   : > { %2826 = vrot.lane.b32.xlu0 %v2825_v17, %s2904_s21 }
 0x141   : > { %2831 = vrot.lane.b32.xlu1 %v2830_v12, %s2904_s21  ;;  %v2562_v12 = vld [vmem:[%s3373_s3 + $0x20] sm:$0xff]  ;;  %s3304_s21 = scalar_lea.vmem [#allocation2], %s2759_s17 }
 0x142   : > { %s2481_s23 = sshll.u32 %s3304_s21, 4  ;;  %s3322_s23 = int_to_ptr.vmem [resolvable:$true] %s2481_s23 }
 0x143   : > { %1987 = vperm.xlu0 %2813, %v1973_v33   ;;  %s2835_s27 = scalar_lea.vmem %s3322_s23, 1536  ;;  %p2842_p0 = scmp.lt.s32.totalorder %s3322_s23, %s2840_s29 }
 0x144   : > { %p2836_p11 = scmp.ne.s32.totalorder %s3322_s23, %s2835_s27  ;;  %p2843_p1 = scmp.lt.s32.totalorder %s2841_s14, %s2835_s27 }
 0x145   : > { %1992 = vperm.xlu1 %2814, %v1974_v38   ;;  %v2571_v38 = vld [vmem:[%s3373_s3 + $0x38] sm:$0xff] }
 0x146   : > { %p2837_p12 = pnand %p2836_p11, %p3001_p5  ;;  %p2844_p2 = por %p2843_p1, %p2842_p0 }
 0x147   : > { %1977 = vperm.xlu0 %2813, %v1971_v34  }
 0x148   : > { %p2838_p13 = pneg %p2837_p12 }
 0x149   : > { %1982 = vperm.xlu1 %2814, %v1972_v39  }
 0x14a   : > { %p2845_p3 = pnand %p2844_p2, %p2838_p13 }
 0x14b   : > { %2191 = vperm.xlu0 %2813, %v2185_v35  }
 0x14d   : > { %2196 = vperm.xlu1 %2814, %v2186_v40  }
 0x14f   : > { %2201 = vperm.xlu0 %2813, %v2187_v36  }
 0x151   : > { %2206 = vperm.xlu1 %2814, %v2188_v41  }
 0x16b   : > { %v508_v42 = vpop.permute.xlu1 %507 }
 0x16d   : > { %v506_v43 = vpop.permute.xlu0 %505 }
 0x16e   : > { %v513_v44 = vsel %vm511_vm2, %v506_v43, %v508_v42 }
 0x16f   : > { %522 = vmatprep.subr.mxu0 %v513_v44  ;;  %v504_v45 = vpop.permute.xlu1 %503 }
 0x170   : > { %v512_v47 = vsel %vm511_vm2, %v504_v45, %v506_v43  ;;  %v2574_v43 = vld [vmem:[%s3373_s3 + $0x40] sm:$0xff] }
 0x171   : > { %v812_v48 = vpop.permute.xlu0 %811  ;;  %523 = vmatpush1.msra.mxu0 %v512_v47 }
 0x172   : > { %2552 = vmatmul.mubr.msk.f32.vlgmr.msra.gmra.mrb[2].mxu0 %vm518_vm3, %v2551_v46  ;;  %666 = vmatprep.subr.mxu0 %v3062_v29 }
 0x173   : > { %667 = vmatpush1.msra.mxu0 %v3066_v30  ;;  %v814_v49 = vpop.permute.xlu1 %813  ;;  %730 = vmatprep.mubr.f32.mxu0 %v2899_v1 }
 0x174   : > { %v819_v51 = vsel %vm817_vm4, %v812_v48, %v814_v49 }
 0x175   : > { %v810_v50 = vpop.permute.xlu0 %809  ;;  %827 = vmatprep.subr.mxu0 %v819_v51 }
 0x176   : > { %v818_v55 = vsel %vm817_vm4, %v810_v50, %v812_v48 }
 0x177   : > { %v974_v52 = vpop.permute.xlu1 %973 }
 0x179   : > { %v978_v54 = vpop.permute.xlu0 %977 }
 0x17a   : > { %2554 = vmatmul.mubr.msk.f32.vlgmr.msra.gmra.mrb[2].mxu0 %vm518_vm3, %v496_v53 }
 0x17b   : > { %828 = vmatpush1.msra.mxu0 %v818_v55  ;;  %v976_v56 = vpop.permute.xlu1 %975  ;;  %891 = vmatprep.mubr.f32.mxu0 %v2899_v1 }
 0x17c   : > { %v983_v58 = vsel %vm981_vm5, %v976_v56, %v978_v54  ;;  %v982_v63 = vsel %vm981_vm5, %v974_v52, %v976_v56 }
 0x17d   : > { %v1138_v57 = vpop.permute.xlu0 %1137  ;;  %991 = vmatprep.subr.mxu0 %v983_v58 }
 0x17f   : > { %v1142_v59 = vpop.permute.xlu1 %1141 }
 0x181   : > { %v1140_v61 = vpop.permute.xlu0 %1139 }
 0x182   : > { %v1147_v62 = vsel %vm1145_vm6, %v1140_v61, %v1142_v59  ;;  %2557 = vmatmul.mubr.msk.f32.vlgmr.msra.gmra.mrb[2].mxu0 %vm518_vm3, %v2556_v60  ;;  %v1146_v7 = vsel %vm1145_vm6, %v1138_v57, %v1140_v61 }
 0x183   : > { %992 = vmatpush1.msra.mxu0 %v982_v63  ;;  %v1306_v0 = vpop.permute.xlu1 %1305  ;;  %1055 = vmatprep.mubr.f32.mxu0 %v2899_v1 }
 0x184   : > { %1155 = vmatprep.subr.mxu0 %v1147_v62 }
 0x185   : > { %v1302_v2 = vpop.permute.xlu0 %1301 }
 0x187   : > { %v3163_v3 = vpop.permute.xlu1 %1469 }
 0x189   : > { %v1304_v5 = vpop.permute.xlu0 %1303 }
 0x18a   : > { %v1311_v6 = vsel %vm1309_vm7, %v1304_v5, %v1306_v0  ;;  %2560 = vmatmul.mubr.msk.f32.vlgmr.msra.gmra.mrb[2].mxu0 %vm518_vm3, %v2559_v4  ;;  %v1310_v16 = vsel %vm1309_vm7, %v1302_v2, %v1304_v5 }
 0x18b   : > { %1156 = vmatpush1.msra.mxu0 %v1146_v7  ;;  %v510_v8 = vpop.permute.xlu1 %509  ;;  %1219 = vmatprep.mubr.f32.mxu0 %v2899_v1 }
 0x18c   : > { %1319 = vmatprep.subr.mxu0 %v1311_v6  ;;  %v514_v9 = vsel %vm511_vm2, %v508_v42, %v510_v8 }
 0x18d   : > { %v1466_v10 = vpop.permute.xlu0 %1465  ;;  %2627 = vmatpush3.msra.mxu1 %v514_v9 }
 0x18e   : > { %2629 = vmatmul.mubr.msk.f32.vlgmr.msra.gmra.mrb[2].mxu1 %vm518_vm3, %v2551_v46  ;;  %2631 = vmatprep.subr.mxu1 %v2899_v1 }
 0x18f   : > { %2632 = vmatpush3.msra.mxu1 %v3060_v28  ;;  %v816_v11 = vpop.permute.xlu1 %815  ;;  %2633 = vmatprep.mubr.msk.f32.mxu1 %vm2905_vm1, %v2899_v1 }
 0x190   : > { %v820_v13 = vsel %vm817_vm4, %v814_v49, %v816_v11  ;;  %2636 = vmatprep.subr.mxu1 %v2899_v1 }
 0x191   : > { %v1468_v14 = vpop.permute.xlu0 %1467 }
 0x192   : > { %v1475_v15 = vsel %vm1473_vm8, %v1468_v14, %v3163_v3  ;;  %2634 = vmatmul.mubr.msk.f32.vlgmr.msra.gmra.mrb[4].mxu1 %vm518_vm3, %v496_v53  ;;  %2563 = vmatmul.mubr.msk.f32.vlgmr.msra.gmra.mrb[2].mxu0 %vm518_vm3, %v2562_v12  ;;  %v1474_v24 = vsel %vm1473_vm8, %v1466_v10, %v1468_v14 }
 0x193   : > { %2637 = vmatpush3.msra.mxu1 %v820_v13  ;;  %1320 = vmatpush1.msra.mxu0 %v1310_v16  ;;  %v1630_v17 = vpop.permute.xlu1 %1629 }
 0x194   : > { %1483 = vmatprep.subr.mxu0 %v1475_v15  ;;  %2638 = vmatprep.mubr.msk.f32.mxu1 %vm2905_vm1, %v2899_v1 }
 0x195   : > { %v1634_v18 = vpop.permute.xlu0 %1633  ;;  %2641 = vmatprep.subr.mxu1 %v2899_v1  ;;  %1383 = vmatprep.mubr.f32.mxu0 %v2899_v1 }
 0x196   : > { %2639 = vmatmul.mubr.msk.f32.vlgmr.msra.gmra.mrb[6].mxu1 %vm518_vm3, %v2556_v60 }
 0x197   : > { %v980_v19 = vpop.permute.xlu1 %979  ;;  %2643 = vmatprep.mubr.msk.f32.mxu1 %vm2905_vm1, %v2899_v1 }
 0x198   : > { %v984_v20 = vsel %vm981_vm5, %v978_v54, %v980_v19 }
 0x199   : > { %v1144_v21 = vpop.permute.xlu0 %1143  ;;  %2642 = vmatpush3.msra.mxu1 %v984_v20 }
 0x19a   : > { %v1148_v23 = vsel %vm1145_vm6, %v1142_v59, %v1144_v21  ;;  %2644 = vmatmul.mubr.msk.f32.vlgmr.msra.gmra.mrb[8].mxu1 %vm518_vm3, %v2559_v4  ;;  %2646 = vmatprep.subr.mxu1 %v2899_v1 }
 0x19b   : > { %2566 = vmatmul.mubr.msk.f32.vlgmr.msra.gmra.mrb[2].mxu0 %vm518_vm3, %v2565_v22  ;;  %2647 = vmatpush3.msra.mxu1 %v1148_v23  ;;  %v1632_v25 = vpop.permute.xlu1 %1631 }
 0x19c   : > { %1484 = vmatpush1.msra.mxu0 %v1474_v24  ;;  %2648 = vmatprep.mubr.msk.f32.mxu1 %vm2905_vm1, %v2899_v1  ;;  %v1639_v27 = vsel %vm1637_vm9, %v1632_v25, %v1634_v18  ;;  %v1638_v33 = vsel %vm1637_vm9, %v1630_v17, %v1632_v25 }
 0x19d   : > { %v1308_v26 = vpop.permute.xlu0 %1307  ;;  %2651 = vmatprep.subr.mxu1 %v2899_v1  ;;  %1647 = vmatprep.subr.mxu0 %v1639_v27 }
 0x19e   : > { %v1312_v28 = vsel %vm1309_vm7, %v1306_v0, %v1308_v26  ;;  %2649 = vmatmul.mubr.msk.f32.vlgmr.msra.gmra.mrb[10].mxu1 %vm518_vm3, %v2562_v12  ;;  %1547 = vmatprep.mubr.f32.mxu0 %v2899_v1 }
 0x19f   : > { %2652 = vmatpush3.msra.mxu1 %v1312_v28  ;;  %v1798_v29 = vpop.permute.xlu1 %1797  ;;  %2653 = vmatprep.mubr.msk.f32.mxu1 %vm2905_vm1, %v2899_v1 }
 0x1a0   : > { %2656 = vmatprep.subr.mxu1 %v2899_v1 }
 0x1a1   : > { %v1796_v30 = vpop.permute.xlu0 %1795 }
 0x1a2   : > { %2654 = vmatmul.mubr.msk.f32.vlgmr.msra.gmra.mrb[12].mxu1 %vm518_vm3, %v2565_v22  ;;  %v1803_v32 = vsel %vm1801_vm10, %v1796_v30, %v1798_v29 }
 0x1a3   : > { %2569 = vmatmul.mubr.msk.f32.vlgmr.msra.gmra.mrb[2].mxu0 %vm518_vm3, %v2568_v31  ;;  %v1472_v34 = vpop.permute.xlu1 %1471  ;;  %2658 = vmatprep.mubr.msk.f32.mxu1 %vm2905_vm1, %v2899_v1 }
 0x1a4   : > { %1648 = vmatpush1.msra.mxu0 %v1638_v33  ;;  %v1476_v35 = vsel %vm1473_vm8, %v3163_v3, %v1472_v34  ;;  %1711 = vmatprep.mubr.f32.mxu0 %v2899_v1  ;;  %v1967_v33 = vld [vmem:[%s3375_s5] sm:$0xff]  ;;  %v1969_v34 = vld [vmem:[%s3375_s5 + $0x10] sm:$0xff] }
 0x1a5   : > { %v1794_v36 = vpop.permute.xlu0 %1793  ;;  %1811 = vmatprep.subr.mxu0 %v1803_v32  ;;  %2657 = vmatpush3.msra.mxu1 %v1476_v35 }
 0x1a6   : > { %2659 = vmatmul.mubr.msk.f32.vlgmr.msra.gmra.mrb[14].mxu1 %vm518_vm3, %v2568_v31  ;;  %2661 = vmatprep.subr.mxu1 %v2899_v1  ;;  %v1802_v42 = vsel %vm1801_vm10, %v1794_v36, %v1796_v30 }
 0x1a7   : > { %v1636_v37 = vpop.permute.xlu1 %1635  ;;  %2663 = vmatprep.mubr.msk.f32.mxu1 %vm2905_vm1, %v2899_v1 }
 0x1a8   : > { %v1640_v39 = vsel %vm1637_vm9, %v1634_v18, %v1636_v37 }
 0x1a9   : > { %v1800_v40 = vpop.permute.xlu0 %1799  ;;  %2662 = vmatpush3.msra.mxu1 %v1640_v39  ;;  %v1968_v39 = vld [vmem:[%s3375_s5 + $0x8] sm:$0xff] }
 0x1aa   : > { %v1804_v41 = vsel %vm1801_vm10, %v1798_v29, %v1800_v40  ;;  %2664 = vmatmul.mubr.msk.f32.vlgmr.msra.gmra.mrb[16].mxu1 %vm518_vm3, %v2571_v38  ;;  %2666 = vmatprep.subr.mxu1 %v2899_v1  ;;  %v1970_v40 = vld [vmem:[%s3375_s5 + $0x18] sm:$0xff] }
 0x1ab   : > { %2572 = vmatmul.mubr.msk.f32.vlgmr.msra.gmra.mrb[2].mxu0 %vm518_vm3, %v2571_v38  ;;  %2667 = vmatpush3.msra.mxu1 %v1804_v41  ;;  %v2181_v41 = vld [vmem:[%s3377_s7] sm:$0xff] }
 0x1ac   : > { %1812 = vmatpush1.msra.mxu0 %v1802_v42  ;;  %2668 = vmatprep.mubr.msk.f32.mxu1 %vm2905_vm1, %v2899_v1  ;;  %v2182_v42 = vld [vmem:[%s3377_s7 + $0x8] sm:$0xff] }
 0x1ad   : > { %1875 = vmatprep.mubr.f32.mxu0 %v2899_v1  ;;  %v2817_v3 = vpop.permute.xlu0 %2816 }
 0x1ae   : > { %2669 = vmatmul.mubr.msk.f32.vlgmr.msra.gmra.mrb[18].mxu1 %vm518_vm3, %v2574_v43  ;;  %v2819_v10 = vunpack.i.h.bf16 %v2817_v3  ;;  %v2818_v11 = vunpack.i.l.bf16 %v2817_v3 }
 0x1af   : > { %2083 = vmatprep.mubr.f32.mxu1 %v2899_v1 }
 0x1b0   : > { %v2234_v24 = vsel %vm1145_vm6, %v2818_v11, %v2819_v10 }
 0x1b1   : > { %v2827_v12 = vpop.permute.xlu0 %2826 }
 0x1b2   : > { %v2829_v15 = vunpack.i.h.bf16 %v2827_v12  ;;  %v2828_v16 = vunpack.i.l.bf16 %v2827_v12 }
 0x1b3   : > { %2575 = vmatmul.mubr.msk.f32.vlgmr.msra.gmra.mrb[2].mxu0 %vm518_vm3, %v2574_v43  ;;  %v2183_v43 = vld [vmem:[%s3377_s7 + $0x10] sm:$0xff] }
 0x1b4   : > { %2071 = vmatprep.mubr.f32.mxu0 %v2899_v1  ;;  %v2233_v26 = vsel %vm1145_vm6, %v2828_v16, %v2818_v11 }
 0x1b8   : > { %v1959_v61 = vpop.permute.xlu1 %1958 }
 0x1bc   : > { %v2822_v6 = vpop.permute.xlu1 %2821 }
 0x1bd   : > { %v2824_v13 = vunpack.i.h.bf16 %v2822_v6  ;;  %v2823_v14 = vunpack.i.l.bf16 %v2822_v6 }
 0x1bf   : > { %v2237_v25 = vsel %vm1145_vm6, %v2823_v14, %v2824_v13  ;;  %v2236_v27 = vsel %vm1145_vm6, %v2829_v15, %v2823_v14 }
 0x1c0   : > { %v2832_v17 = vpop.permute.xlu1 %2831  ;;  %v2697_v35 = vpack.c.bf16 %v2237_v25, %v2234_v24  ;;  %v2699_v36 = vpack.c.bf16 %v2236_v27, %v2233_v26 }
 0x1c1   : > { %v2834_v18 = vunpack.i.h.bf16 %v2832_v17  ;;  %v2833_v19 = vunpack.i.l.bf16 %v2832_v17 }
 0x1c3   : > { %v2235_v30 = vsel %vm1145_vm6, %v2819_v10, %v2833_v19  ;;  %v2238_v31 = vsel %vm1145_vm6, %v2824_v13, %v2834_v18 }
 0x1c4   : > { %v2701_v38 = vpack.c.bf16 %v2238_v31, %v2235_v30 }
 0x261   : > { %v659_v44 = vpop.f32.mrb[2].mxu1 }
 0x262   : > { %v2630_v45 = vpop.f32.mrb[3].mxu1 }
 0x263   : > { %v1988_v45 = vpop.permute.xlu0 %1987 }
 0x265   : > { %v803_v46 = vpop.f32.mrb[4].mxu1 }
 0x266   : > { %v804_v47 = vadd.f32 %v803_v46, %v659_v44  ;;  %v2635_v48 = vpop.f32.mrb[5].mxu1  ;;  %v2184_v44 = vld [vmem:[%s3377_s7 + $0x18] sm:$0xff] }
 0x267   : > { %v1978_v46 = vpop.permute.xlu0 %1977 }
 0x269   : > { %v964_v49 = vpop.f32.mrb[6].mxu1 }
 0x26a   : > { %v970_v50 = vadd.f32 %v964_v49, %v804_v47  ;;  %v2640_v51 = vpop.f32.mrb[7].mxu1  ;;  %v1993_v47 = vpop.permute.xlu1 %1992 }
 0x26d   : > { %v1128_v52 = vpop.f32.mrb[8].mxu1 }
 0x26e   : > { %v1134_v53 = vadd.f32 %v1128_v52, %v970_v50  ;;  %v2645_v54 = vpop.f32.mrb[9].mxu1  ;;  %v2192_v50 = vpop.permute.xlu0 %2191 }
 0x26f   : > { %v1983_v51 = vpop.permute.xlu1 %1982 }
 0x271   : > { %v1292_v55 = vpop.f32.mrb[10].mxu1 }
 0x272   : > { %v1298_v56 = vadd.f32 %v1292_v55, %v1134_v53  ;;  %v2650_v57 = vpop.f32.mrb[11].mxu1  ;;  %v2707_v53 = vadd.f32 %v2192_v50, %v1978_v46 }
 0x273   : > { %v2197_v57 = vpop.permute.xlu1 %2196 }
 0x275   : > { %v1456_v58 = vpop.f32.mrb[12].mxu1 }
 0x276   : > { %v1462_v59 = vadd.f32 %v1456_v58, %v1298_v56  ;;  %v2655_v60 = vpop.f32.mrb[13].mxu1 }
 0x279   : > { %v1620_v62 = vpop.f32.mrb[14].mxu1 }
 0x27a   : > { %v1626_v63 = vadd.f32 %v1620_v62, %v1462_v59  ;;  %v2660_v0 = vpop.f32.mrb[15].mxu1  ;;  %v2711_v59 = vadd.f32 %v2197_v57, %v1983_v51 }
 0x27d   : > { %v1784_v2 = vpop.f32.mrb[16].mxu1 }
 0x27e   : > { %v1790_v4 = vadd.f32 %v1784_v2, %v1626_v63  ;;  %v2665_v5 = vpop.f32.mrb[17].mxu1 }
 0x281   : > { %v1948_v7 = vpop.f32.mrb[18].mxu1 }
 0x282   : > { %v1954_v8 = vadd.f32 %v1948_v7, %v1790_v4  ;;  %v2670_v9 = vpop.f32.mrb[19].mxu1  ;;  %v2202_v4 = vpop.permute.xlu0 %2201 }
 0x283   : > { %v2207_v9 = vpop.permute.xlu1 %2206 }
 0x284   : > { %v1963_v28 = vadd.f32 %v1959_v61, %v1954_v8 }
 0x286   : > { %v1877_v20 = vpop.f32.mrb[2].mxu0  ;;  %v1966_v37 = vmax.f32 %v1963_v28, 0.0  ;;  %v2733_v28 = vadd.f32 %v2202_v4, %v1988_v45 }
 0x287   : > { %v1961_v21 = vadd.f32 %v1959_v61, %v1877_v20  ;;  %v1879_v22 = vpop.f32.mrb[3].mxu0 }
 0x288   : > { %v1962_v23 = vadd.f32 %v1959_v61, %v1879_v22 }
 0x289   : > { %v1964_v32 = vmax.f32 %v1961_v21, 0.0 }
 0x28a   : > { %v1965_v29 = vmax.f32 %v1962_v23, 0.0  ;;  %v2731_v23 = vadd.f32 %v2207_v9, %v1993_v47 }
 0x28c   : > { %2007 = vmatprep.subr.mxu0 %v1965_v29  ;;  %2705 = vmatprep.subr.mxu1 %v1965_v29 }
 0x28d   : > { %2008 = vmatpush1.msra.mxu0 %v1964_v32  ;;  %2706 = vmatpush1.msra.mxu1 %v1964_v32 }
 0x28e   : > { %2577 = vmatmul.mubr.msk.f32.vlgmr.msra.gmra.mrb[4].mxu0 %vm518_vm3, %v1967_v33  ;;  %2579 = vmatmul.mubr.msk.f32.vlgmr.msra.gmra.mrb[20].mxu1 %vm518_vm3, %v1969_v34 }
 0x28f   : > { %2671 = vmatprep.subr.mxu1 %v1966_v37  ;;  %2698 = vmatprep.subr.bf16.mxu0 %v2697_v35 }
 0x290   : > { %2672 = vmatpush3.msra.mxu1 %v1966_v37  ;;  %2700 = vmatpush1.bf16.msra.mxu0 %v2699_v36 }
 0x291   : > { %2702 = vmatprep.subr.bf16.mxu1 %v2701_v38  ;;  %2077 = vmatprep.mubr.f32.mxu0 %v2899_v1 }
 0x292   : > { %2089 = vmatprep.mubr.f32.mxu1 %v2899_v1  ;;  %2578 = vmatmul.mubr.msk.f32.gmra.mrb[6].mxu0 %vm518_vm3, %v1968_v39 }
 0x293   : > { %2580 = vmatmul.mubr.msk.f32.gmra.mrb[22].mxu1 %vm518_vm3, %v1970_v40  ;;  %2321 = vmatprep.mubr.f32.mxu0 %v2899_v1 }
 0x294   : > { %2673 = vmatprep.mubr.msk.f32.mxu1 %vm518_vm3, %v1967_v33 }
 0x296   : > { %2585 = vmatmul.mubr.msk.f32.vlgmr.msra.gmra.mrb[4].mxu0 %vm346_vm0, %v2181_v41 }
 0x297   : > { %2674 = vmatmul.mubr.msk.f32.vlgmr.msra.gmra.mrb[24].mxu1 %vm518_vm3, %v1968_v39  ;;  %2327 = vmatprep.mubr.f32.mxu0 %v2899_v1 }
 0x298   : > { %2704 = vmatpush3.bf16.msra.mxu1 %v2701_v38  ;;  %2676 = vmatprep.mubr.msk.f32.mxu1 %vm518_vm3, %v1969_v34 }
 0x29a   : > { %2586 = vmatmul.mubr.msk.f32.gmra.mrb[6].mxu0 %vm346_vm0, %v2182_v42 }
 0x29b   : > { %2677 = vmatmul.mubr.msk.f32.gmra.mrb[26].mxu1 %vm518_vm3, %v1970_v40  ;;  %2333 = vmatprep.mubr.f32.mxu0 %v2899_v1 }
 0x29c   : > { %2683 = vmatprep.mubr.msk.f32.mxu1 %vm346_vm0, %v2181_v41 }
 0x29e   : > { %2587 = vmatmul.mubr.msk.f32.gmra.mrb[8].mxu0 %vm346_vm0, %v2183_v43 }
 0x29f   : > { %2684 = vmatmul.mubr.msk.f32.vlgmr.msra.gmra.mrb[24].mxu1 %vm346_vm0, %v2182_v42  ;;  %2339 = vmatprep.mubr.f32.mxu0 %v2899_v1 }
 0x2a0   : > { %2686 = vmatprep.mubr.msk.f32.mxu1 %vm346_vm0, %v2183_v43 }
 0x2a2   : > { %2588 = vmatmul.mubr.msk.f32.gmra.mrb[10].mxu0 %vm346_vm0, %v2184_v44 }
 0x2a3   : > { %2687 = vmatmul.mubr.msk.f32.gmra.mrb[26].mxu1 %vm346_vm0, %v2184_v44 }
 0x361   : > { %v2085_v48 = vpop.f32.mrb[20].mxu1 }
 0x362   : > { %v2087_v49 = vpop.f32.mrb[21].mxu1  ;;  %v2086_v60 = vadd.f32 %v2085_v48, %v1988_v45 }
 0x363   : > { %v2088_v62 = vadd.f32 %v2087_v49, %v1988_v45 }
 0x364   : > { %v2716_v8 = vadd.f32 %v2202_v4, %v2086_v60 }
 0x365   : > { %v2719_v13 = vadd.f32 %v2202_v4, %v2088_v62 }
 0x366   : > { %v2091_v52 = vpop.f32.mrb[22].mxu1 }
 0x367   : > { %v2093_v1 = vpop.f32.mrb[23].mxu1  ;;  %v2092_v6 = vadd.f32 %v2091_v52, %v1993_v47 }
 0x368   : > { %v2094_v10 = vadd.f32 %v2093_v1, %v1993_v47 }
 0x369   : > { %v2323_v54 = vpop.f32.mrb[4].mxu0  ;;  %v2722_v22 = vadd.f32 %v2207_v9, %v2092_v6 }
 0x36a   : > { %v2708_v55 = vadd.f32 %v2707_v53, %v2323_v54  ;;  %v2325_v56 = vpop.f32.mrb[5].mxu0  ;;  %v2725_v27 = vadd.f32 %v2207_v9, %v2094_v10 }
 0x36b   : > { %v2710_v58 = vadd.f32 %v2707_v53, %v2325_v56 }
 0x36c   : > { %v2443_v61 = vmax.f32 %v2708_v55, 0.0 }
 0x36d   : > { %v2444_v63 = vmax.f32 %v2710_v58, 0.0  ;;  %v2329_v0 = vpop.f32.mrb[6].mxu0 }
 0x36e   : > { %2455 = vst [vmem:[%s3304_s21] sm:$0xff] %v2443_v61  ;;  %v2712_v2 = vadd.f32 %v2711_v59, %v2329_v0  ;;  %v2331_v3 = vpop.f32.mrb[7].mxu0 }
 0x36f   : > { %2456 = vst [vmem:[%s3304_s21 + $0x8] sm:$0xff] %v2444_v63  ;;  %v2714_v5 = vadd.f32 %v2711_v59, %v2331_v3 }
 0x370   : > { %v2446_v7 = vmax.f32 %v2712_v2, 0.0 }
 0x371   : > { %v2447_v11 = vmax.f32 %v2714_v5, 0.0  ;;  %v2335_v12 = vpop.f32.mrb[8].mxu0 }
 0x372   : > { %2458 = vst [vmem:[%s3304_s21 + $0x18] sm:$0xff] %v2446_v7  ;;  %v2717_v14 = vadd.f32 %v2716_v8, %v2335_v12  ;;  %v2685_v15 = vpop.f32.mrb[24].mxu1  ;;  %v2337_v16 = vpop.f32.mrb[9].mxu0 }
 0x373   : > { %2459 = vst [vmem:[%s3304_s21 + $0x20] sm:$0xff] %v2447_v11  ;;  %v2728_v17 = vadd.f32 %v2711_v59, %v2685_v15  ;;  %v2720_v18 = vadd.f32 %v2719_v13, %v2337_v16  ;;  %v2412_v19 = vpop.f32.mrb[25].mxu1 }
 0x374   : > { %v2449_v20 = vmax.f32 %v2717_v14, 0.0  ;;  %v2730_v21 = vadd.f32 %v2707_v53, %v2412_v19 }
 0x375   : > { %v2448_v24 = vmax.f32 %v2728_v17, 0.0  ;;  %v2450_v25 = vmax.f32 %v2720_v18, 0.0  ;;  %v2341_v26 = vpop.f32.mrb[10].mxu0 }
 0x376   : > { %2461 = vst [vmem:[%s3304_s21 + $0x30] sm:$0xff] %v2449_v20  ;;  %v2445_v29 = vmax.f32 %v2730_v21, 0.0  ;;  %v2723_v30 = vadd.f32 %v2722_v22, %v2341_v26  ;;  %v2688_v31 = vpop.f32.mrb[26].mxu1  ;;  %v2343_v32 = vpop.f32.mrb[11].mxu0 }
 0x377   : > { %2460 = vst [vmem:[%s3304_s21 + $0x28] sm:$0xff] %v2448_v24  ;;  %2462 = vst [vmem:[%s3304_s21 + $0x38] sm:$0xff] %v2450_v25  ;;  %v2732_v33 = vadd.f32 %v2731_v23, %v2688_v31  ;;  %v2726_v34 = vadd.f32 %v2725_v27, %v2343_v32  ;;  %v2422_v35 = vpop.f32.mrb[27].mxu1 }
 0x378   : > { %2457 = vst [vmem:[%s3304_s21 + $0x10] sm:$0xff] %v2445_v29  ;;  %v2452_v36 = vmax.f32 %v2723_v30, 0.0  ;;  %v2734_v37 = vadd.f32 %v2733_v28, %v2422_v35 }
 0x379   : > { %v2454_v38 = vmax.f32 %v2732_v33, 0.0  ;;  %v2453_v39 = vmax.f32 %v2726_v34, 0.0 }
 0x37a   : > { %2464 = vst [vmem:[%s3304_s21 + $0x48] sm:$0xff] %v2452_v36  ;;  %v2451_v40 = vmax.f32 %v2734_v37, 0.0 }
 0x37b   : > { %2466 = vst [vmem:[%s3304_s21 + $0x58] sm:$0xff] %v2454_v38  ;;  %2465 = vst [vmem:[%s3304_s21 + $0x50] sm:$0xff] %v2453_v39 }
 0x37c   : > { %2463 = vst [vmem:[%s3304_s21 + $0x40] sm:$0xff] %v2451_v40 }
 0x37d   : > { %2848 = shalt.err (!%p2845_p3)
}
 0x37e   : > { %s2849_s16 = scalar_lea.hbm %s3319_s25, 1536  ;;  %s2853_s22 = scalar_lea.hbm %s3379_s9, 3072 }
 0x37f   : > { %p2850_p4 = scmp.ne.s32.totalorder %s3319_s25, %s2849_s16  ;;  %p2854_p9 = scmp.lt.u32.totalorder %s3319_s25, %s3379_s9 }
 0x380   : > { %p2855_p10 = scmp.lt.u32.totalorder %s2853_s22, %s2849_s16  ;;  %p2857_p12 = scmp.lt.u32.totalorder %s2849_s16, %s3319_s25 }
 0x381   : > { %p2851_p7 = pnand %p2850_p4, %p3001_p5 }
 0x382   : > { %p2856_p11 = por %p2855_p10, %p2854_p9 }
 0x383   : > { %p2852_p8 = pneg %p2851_p7 }
 0x384   : > { %p2858_p13 = por %p2857_p12, %p2856_p11 }
 0x386   : > { %p2859_p0 = pnand %p2858_p13, %p2852_p8 }
 0x388   : > { %2862 = shalt.err (!%p2859_p0)
}
 0x389   : > { %s2911_s27 = smov 384   ;;  %s2912_s28 = smov 24  }
 0x38a   : > { %2761 = dma.vmem_to_hbm [thread:$0]  (%p3001_p5), %s3322_s23, 1536, %s3319_s25, %s3329_s26, %s2911_s27, %s2911_s27, %s2912_s28  }
 0x38b PF: > { %p2767_p1 = scmp.ge.s32.totalorder %s2897_s12, 2  ;;  %s2496_s29 = sand.u32 1, %s2885_s30  }
 0x38c   : > { %s2497_s14 = scalar_lea.sflag [#allocation3], %s2496_s29 }
 0x38d   : > { %p2764_p2 = pnand %p2767_p1, %p3005_p6 }
 0x38f   : > { %2880 = dma.done.wait (!%p2764_p2), %s2497_s14, 1536  }
 0x390   : > { %2882 = vsyncadd (!%p2764_p2), %s2497_s14, 4294965760  ;;  %p19_p3 = scmp.ge.s32.totalorder %s2988_s15, 4   ;;  %s3382_s30 = smov %s2889_s10 }
 0x391   : > { %s3383_s10 = smov %s2893_s11  ;;  %s3384_s11 = smov %s2999_s18 }
 0x392   : > { %s3385_s12 = smov %s2988_s15  ;;  %21 = sbr.rel (!%p19_p3) target bundleno = 3 (0x3), region = 99 }
 0x399   :  { %2502 = vsyncpa [#allocation3], 1 }
 0x39a   :  { %2504 = vsyncpa [#allocation3 + $0x1], 1 }

</bundles_post_ra>
